<compile_context>
chip_gen: v7x
topology: tpu7x:2x2x1
jax: 0.10.0
libtpu: 0.0.40
codegen_flags: <defaults>
</compile_context>

<pallas_src>
import functools

import jax
import jax.numpy as jnp
from jax import lax
from jax.experimental import pallas as pl
from jax.experimental.pallas import tpu as pltpu

_LANES = 128
_SUBLANES = 8


def _round_up(x, m):
    return ((x + m - 1) // m) * m


def _choose_fold(num_rows, n, max_nk=512):
    """Rows-per-folded-row k.

    k must divide num_rows (so the fold is a free reshape view, no jnp.pad
    copy) and k*n <= max_nk (bounds the mean-projector matmul cost).  Prefer
    full lane density (k*n a multiple of 128), then the smallest such k*n.
    """
    best_k, best_score = 1, (-1.0, 0.0)
    for k in range(1, max(1, max_nk // n) + 1):
        if num_rows % k:
            continue
        nk = k * n
        score = (nk / _round_up(nk, _LANES), -nk)
        if score > best_score:
            best_k, best_score = k, score
    return best_k


def _vmem_capacity_bytes():
    try:
        return int(pltpu.get_tpu_info().vmem_capacity_bytes)
    except Exception:
        return 64 * 1024 * 1024  # conservative fallback (v7x per-TC budget)


def _write_partials(out_ref, std_sum, abs_sum):
    # Pack both partial sums into lanes 0/1 of one lane-dense (1, 1, 128) block.
    lane = lax.broadcasted_iota(jnp.int32, out_ref.shape, 2)
    out_ref[...] = (jnp.where(lane == 0, std_sum, 0.0)
                    + jnp.where(lane == 1, abs_sum, 0.0)).astype(jnp.float32)


def _mask_tail_rows(g, e, tile_r, rf):
    # Last block over-reads past the true row count; the OOB tail is
    # uninitialized VMEM (may contain NaN/Inf), so mask BEFORE any arithmetic.
    row = pl.program_id(0) * tile_r + lax.broadcasted_iota(jnp.int32, (tile_r, 1), 0)
    valid = row < rf
    return jnp.where(valid, g, 0.0), jnp.where(valid, e, 0.0)


def _partials_kernel_k1(ones_ref, g_ref, e_ref, out_ref, *, n, tile_r, rf, mask_tail):
    """k == 1: one logical row per physical row (row length n).

    Row reductions go through the MXU via a resident ones column; zeroed
    (masked) rows contribute exactly 0 to both partial sums.
    """
    g = g_ref[...].astype(jnp.float32)
    e = e_ref[...].astype(jnp.float32)
    if mask_tail:
        g, e = _mask_tail_rows(g, e, tile_r, rf)

    ones = ones_ref[...]                                                    # (n, 1)
    inv_n = 1.0 / n
    inv_nm1 = 1.0 / (n - 1)

    mean_g = jnp.dot(g, ones, preferred_element_type=jnp.float32) * inv_n   # (T, 1)
    mean_e = jnp.dot(e, ones, preferred_element_type=jnp.float32) * inv_n   # (T, 1)
    dev = g - mean_g
    var = jnp.dot(dev * dev, ones, preferred_element_type=jnp.float32) * inv_nm1
    std_sum = jnp.sum(jnp.sqrt(var))
    abs_sum = jnp.sum(jnp.abs(g - mean_e))
    _write_partials(out_ref, std_sum, abs_sum)


def _partials_kernel_fold(smat_ref, proj_ref, g_ref, e_ref, out_ref,
                          *, n, tile_r, rf, mask_tail):
    """k > 1: each physical row packs k logical rows of length n.

    smat: (k*n, k) 0/1 segment indicator; proj: (k*n, k*n) block-diagonal
    mean projector with 1/n folded in.  Both are VMEM-resident constants.
    Std uses one-pass sum / sum-of-squares (no mean_g broadcast needed).
    """
    g = g_ref[...].astype(jnp.float32)
    e = e_ref[...].astype(jnp.float32)
    if mask_tail:
        g, e = _mask_tail_rows(g, e, tile_r, rf)

    smat = smat_ref[...]
    proj = proj_ref[...]
    inv_n = 1.0 / n
    inv_nm1 = 1.0 / (n - 1)

    sum_g = jnp.dot(g, smat, preferred_element_type=jnp.float32)            # (T, k)
    sum_g2 = jnp.dot(g * g, smat, preferred_element_type=jnp.float32)       # (T, k)
    var = (sum_g2 - sum_g * sum_g * inv_n) * inv_nm1
    std_sum = jnp.sum(jnp.sqrt(jnp.maximum(var, 0.0)))                      # clamp fp rounding

    mean_e = jnp.dot(e, proj, preferred_element_type=jnp.float32)           # (T, k*n)
    abs_sum = jnp.sum(jnp.abs(g - mean_e))
    _write_partials(out_ref, std_sum, abs_sum)


def uncertainty_pseudo_label_loss(gaze, gaze_ema, lamda_pseudo=0.5, *, max_tile_rows=None):
    assert gaze.shape == gaze_ema.shape
    B, C, N = gaze.shape
    if N < 2:
        raise ValueError("torch.std(dim=2) is the unbiased estimator: N == 1 would "
                         "silently make the whole loss NaN; refusing.")
    R = B * C

    # --- fold / tile geometry -------------------------------------------------
    k = _choose_fold(R, N)
    NK = k * N
    RF = R // k

    in_itemsize = jnp.dtype(gaze.dtype).itemsize
    cap = _vmem_capacity_bytes()
    usable = max(16 << 20, min(cap - (8 << 20), (cap * 7) // 8))

    # Resident constants (counted twice in case the pipeliner double-buffers them).
    aux_bytes = 2 * (N * 4) if k == 1 else 2 * (NK * k + NK * NK) * 4
    # Per tile-row: 2 inputs x 2 pipeline buffers at native dtype + ~8 f32 temps.
    per_row_bytes = NK * (2 * 2 * in_itemsize + 8 * 4)

    if per_row_bytes * _SUBLANES + aux_bytes + (2 << 20) > usable:
        # TODO(synk): rows too long for one VMEM tile (huge N) need the N axis split
        # over a trailing "arbitrary" grid dim with a one-pass sum/sum-sq reduction.
        raise ValueError(f"N={N} is too large for a single VMEM tile on this TPU")

    tile_r = (usable - aux_bytes - (2 << 20)) // per_row_bytes
    tile_r = min(tile_r, 4096)
    # >= ~4 grid blocks for v7x megacore + DMA/compute overlap, but keep each block
    # >= ~64K elements so the per-step overhead stays amortized.
    min_block_rows = max(_SUBLANES, _round_up(max(1, (1 << 16) // NK), _SUBLANES))
    four_way = _round_up(pl.cdiv(RF, 4), _SUBLANES)
    tile_r = min(tile_r, max(min_block_rows, four_way))
    if max_tile_rows is not None:
        tile_r = min(tile_r, max(_SUBLANES, (max_tile_rows // _SUBLANES) * _SUBLANES))

    if RF <= tile_r:
        tile_r = RF                      # single full-extent block, no masking
        num_blocks = 1
    else:
        tile_r = max(_SUBLANES, (tile_r // _SUBLANES) * _SUBLANES)
        num_blocks = pl.cdiv(RF, tile_r)
        if num_blocks % 2 == 1:          # prefer an even block count (2 TCs on v7x)
            alt = _round_up(pl.cdiv(RF, num_blocks + 1), _SUBLANES)
            if _SUBLANES <= alt <= tile_r:
                tile_r = alt
                num_blocks = pl.cdiv(RF, tile_r)
    mask_tail = num_blocks * tile_r > RF

    footprint = tile_r * per_row_bytes + aux_bytes + (4 << 20)
    vmem_limit = int(min(cap - (4 << 20), max(int(footprint * 3 // 2), 32 << 20)))

    # --- inputs & constants (no jnp.pad: reshape is a free contiguous view) ----
    gf = gaze.reshape(RF, NK)
    ef = gaze_ema.reshape(RF, NK)

    if k == 1:
        aux = (jnp.ones((N, 1), dtype=jnp.float32),)
        aux_specs = [pl.BlockSpec((N, 1), lambda r: (0, 0))]
        kernel = functools.partial(_partials_kernel_k1, n=N, tile_r=tile_r,
                                   rf=RF, mask_tail=mask_tail)
    else:
        seg = jnp.arange(NK, dtype=jnp.int32) // N
        smat = (seg[:, None] == jnp.arange(k, dtype=jnp.int32)[None, :]).astype(jnp.float32)
        proj = (seg[:, None] == seg[None, :]).astype(jnp.float32) * (1.0 / N)
        aux = (smat, proj)
        aux_specs = [pl.BlockSpec((NK, k), lambda r: (0, 0)),
                     pl.BlockSpec((NK, NK), lambda r: (0, 0))]
        kernel = functools.partial(_partials_kernel_fold, n=N, tile_r=tile_r,
                                   rf=RF, mask_tail=mask_tail)

    in_spec = pl.BlockSpec((tile_r, NK), lambda r: (r, 0))
    out_spec = pl.BlockSpec((1, 1, _LANES), lambda r: (r, 0, 0))

    partials = pl.pallas_call(
        kernel,
        out_shape=jax.ShapeDtypeStruct((num_blocks, 1, _LANES), jnp.float32),
        grid_spec=pltpu.PrefetchScalarGridSpec(
            num_scalar_prefetch=0,
            grid=(num_blocks,),
            in_specs=aux_specs + [in_spec, in_spec],
            out_specs=out_spec,
        ),
        compiler_params=pltpu.CompilerParams(
            dimension_semantics=("parallel",),   # independent row tiles -> both TCs
            vmem_limit_bytes=vmem_limit,
        ),
    )(*aux, gf, ef)

    # Tiny final combine in the wrapper: keeps the kernel epilogue-free and means
    # changing lamda_pseudo never recompiles the kernel.
    total_std = jnp.sum(partials[:, 0, 0])
    total_abs = jnp.sum(partials[:, 0, 1])
    return total_std / R + lamda_pseudo * (total_abs / (R * N))


def _reference(gaze, gaze_ema, lamda_pseudo=0.5):
    std = jnp.std(gaze, axis=2, ddof=1)                    # unbiased, like torch.std
    mean = jnp.mean(gaze_ema, axis=2, keepdims=True)
    return jnp.mean(std) + lamda_pseudo * jnp.mean(jnp.abs(gaze - mean))


if __name__ == "__main__":
    key = jax.random.PRNGKey(0)

    # (shape, max_tile_rows, dtype) -- the small caps just exercise the
    # multi-block / masked-tail / k==1 / folded paths at tiny sizes; production
    # shapes use the VMEM-derived tiles automatically.
    cases = [
        ((2, 2, 16), None, jnp.float32),    # folded (k=4), single full-extent block
        ((128, 2, 96), 16, jnp.float32),    # folded to 384 lanes, 4 parallel blocks
        ((40, 2, 16), 8, jnp.float32),      # folded (k=8), masked ragged last block
        ((16, 2, 300), 8, jnp.float32),     # k==1 path, 4 parallel blocks
        ((10, 2, 300), 8, jnp.float32),     # k==1 path, masked ragged last block
        ((64, 2, 48), None, jnp.bfloat16),  # native-bf16 inputs on the wire
    ]

    for shape, mtr, dtype in cases:
        key, k1, k2 = jax.random.split(key, 3)
        gaze = jax.random.normal(k1, shape, dtype=jnp.float32)
        gaze_ema = jax.random.normal(k2, shape, dtype=jnp.float32)
        if dtype != jnp.float32:
            gaze = gaze.astype(dtype)
            gaze_ema = gaze_ema.astype(dtype)

        loss = uncertainty_pseudo_label_loss(gaze, gaze_ema, 0.5, max_tile_rows=mtr)
        loss = jax.block_until_ready(loss)

        ref = _reference(gaze.astype(jnp.float32), gaze_ema.astype(jnp.float32), 0.5)
        assert jnp.allclose(loss, ref, rtol=2e-4, atol=1e-5), (shape, dtype, loss, ref)

    print("KERNEL_OK")
</pallas_src>

<mosaic_0001>
module attributes {stable_mosaic.version = 11 : i64} {
  func.func @_partials_kernel_fold(%arg0: i32, %arg1: memref<64x4xf32, #tpu.memory_space<vmem>>, %arg2: memref<64x64xf32, #tpu.memory_space<vmem>>, %arg3: memref<1x64xf32, #tpu.memory_space<vmem>>, %arg4: memref<1x64xf32, #tpu.memory_space<vmem>>, %arg5: memref<1x1x128xf32, #tpu.memory_space<vmem>>) attributes {dimension_semantics = [#tpu.dimension_semantics<parallel>], iteration_bounds = array<i64: 1>, scalar_prefetch = 0 : i64, scratch_operands = 0 : i64, tpu.core_type = #tpu.core_type<tc>, window_params = [{pipeline_mode = #tpu.pipeline_mode<synchronous>, transform_indices = @transform_0, window_bounds = array<i64: 64, 4>}, {pipeline_mode = #tpu.pipeline_mode<synchronous>, transform_indices = @transform_1, window_bounds = array<i64: 64, 64>}, {transform_indices = @transform_2, window_bounds = array<i64: 1, 64>}, {transform_indices = @transform_3, window_bounds = array<i64: 1, 64>}, {transform_indices = @transform_4, window_bounds = array<i64: 1, 1, 128>}]} {
    %c0 = arith.constant 0 : index
    %c0_0 = arith.constant 0 : index
    %0 = vector.load %arg3[%c0, %c0_0] : memref<1x64xf32, #tpu.memory_space<vmem>>, vector<1x64xf32>
    %c0_1 = arith.constant 0 : index
    %c0_2 = arith.constant 0 : index
    %1 = vector.load %arg4[%c0_1, %c0_2] : memref<1x64xf32, #tpu.memory_space<vmem>>, vector<1x64xf32>
    %c0_3 = arith.constant 0 : index
    %c0_4 = arith.constant 0 : index
    %2 = vector.load %arg1[%c0_3, %c0_4] : memref<64x4xf32, #tpu.memory_space<vmem>>, vector<64x4xf32>
    %c0_5 = arith.constant 0 : index
    %c0_6 = arith.constant 0 : index
    %3 = vector.load %arg2[%c0_5, %c0_6] : memref<64x64xf32, #tpu.memory_space<vmem>>, vector<64x64xf32>
    %cst = arith.constant dense<0.000000e+00> : vector<1x4xf32>
    %4 = tpu.matmul %0, %2, %cst {dimension_numbers = #tpu.dot_dimension_numbers<[1], [0], [0], [1], [0, 0, 1, 1], [], []>} : vector<1x64xf32>, vector<64x4xf32>, vector<1x4xf32> -> vector<1x4xf32>
    %5 = arith.mulf %0, %0 : vector<1x64xf32>
    %cst_7 = arith.constant dense<0.000000e+00> : vector<1x4xf32>
    %6 = tpu.matmul %5, %2, %cst_7 {dimension_numbers = #tpu.dot_dimension_numbers<[1], [0], [0], [1], [0, 0, 1, 1], [], []>} : vector<1x64xf32>, vector<64x4xf32>, vector<1x4xf32> -> vector<1x4xf32>
    %7 = arith.mulf %4, %4 : vector<1x4xf32>
    %cst_8 = arith.constant 6.250000e-02 : f32
    %8 = vector.broadcast %cst_8 : f32 to vector<1x4xf32>
    %9 = arith.mulf %7, %8 : vector<1x4xf32>
    %10 = arith.subf %6, %9 : vector<1x4xf32>
    %cst_9 = arith.constant 0.0666666701 : f32
    %11 = vector.broadcast %cst_9 : f32 to vector<1x4xf32>
    %12 = arith.mulf %10, %11 : vector<1x4xf32>
    %cst_10 = arith.constant 0.000000e+00 : f32
    %13 = vector.broadcast %cst_10 : f32 to vector<1x4xf32>
    %14 = arith.maximumf %12, %13 : vector<1x4xf32>
    %15 = math.sqrt %14 : vector<1x4xf32>
    %16 = vector.shape_cast %15 : vector<1x4xf32> to vector<1x1x4xf32>
    %cst_11 = arith.constant dense<0.000000e+00> : vector<1xf32>
    %17 = vector.multi_reduction <add>, %16, %cst_11 [1, 2] : vector<1x1x4xf32> to vector<1xf32>
    %18 = vector.shape_cast %17 : vector<1xf32> to vector<1x1x1xf32>
    %19 = vector.extract %18[0, 0, 0] : f32 from vector<1x1x1xf32>
    %cst_12 = arith.constant dense<0.000000e+00> : vector<1x64xf32>
    %20 = tpu.matmul %1, %3, %cst_12 {dimension_numbers = #tpu.dot_dimension_numbers<[1], [0], [0], [1], [0, 0, 1, 1], [], []>} : vector<1x64xf32>, vector<64x64xf32>, vector<1x64xf32> -> vector<1x64xf32>
    %21 = arith.subf %0, %20 : vector<1x64xf32>
    %22 = math.absf %21 : vector<1x64xf32>
    %23 = vector.shape_cast %22 : vector<1x64xf32> to vector<1x1x64xf32>
    %cst_13 = arith.constant dense<0.000000e+00> : vector<1xf32>
    %24 = vector.multi_reduction <add>, %23, %cst_13 [1, 2] : vector<1x1x64xf32> to vector<1xf32>
    %25 = vector.shape_cast %24 : vector<1xf32> to vector<1x1x1xf32>
    %26 = vector.extract %25[0, 0, 0] : f32 from vector<1x1x1xf32>
    %27 = tpu.iota {dimensions = array<i32: 2>} : vector<1x1x128xi32>
    %c0_i32 = arith.constant 0 : i32
    %28 = vector.broadcast %c0_i32 : i32 to vector<1x1x128xi32>
    %29 = arith.cmpi eq, %27, %28 : vector<1x1x128xi32>
    %cst_14 = arith.constant 0.000000e+00 : f32
    %30 = vector.broadcast %19 : f32 to vector<1x1x128xf32>
    %31 = vector.broadcast %cst_14 : f32 to vector<1x1x128xf32>
    %32 = arith.select %29, %30, %31 : vector<1x1x128xi1>, vector<1x1x128xf32>
    %c1_i32 = arith.constant 1 : i32
    %33 = vector.broadcast %c1_i32 : i32 to vector<1x1x128xi32>
    %34 = arith.cmpi eq, %27, %33 : vector<1x1x128xi32>
    %cst_15 = arith.constant 0.000000e+00 : f32
    %35 = vector.broadcast %26 : f32 to vector<1x1x128xf32>
    %36 = vector.broadcast %cst_15 : f32 to vector<1x1x128xf32>
    %37 = arith.select %34, %35, %36 : vector<1x1x128xi1>, vector<1x1x128xf32>
    %38 = arith.addf %32, %37 : vector<1x1x128xf32>
    %c0_16 = arith.constant 0 : index
    %c0_17 = arith.constant 0 : index
    %c0_18 = arith.constant 0 : index
    %39 = vector.load %arg5[%c0_16, %c0_17, %c0_18] : memref<1x1x128xf32, #tpu.memory_space<vmem>>, vector<1x1x128xf32>
    tpu.vector_store %arg5[%c0_16, %c0_17, %c0_18], %38 {strides = array<i32>} : memref<1x1x128xf32, #tpu.memory_space<vmem>>, vector<1x1x128xf32>,
    return
  }
  func.func @transform_0(%arg0: i32) -> (i32, i32) {
    %c0_i32 = arith.constant 0 : i32
    %c0_i32_0 = arith.constant 0 : i32
    %c0_i32_1 = arith.constant 0 : i32
    return %c0_i32, %c0_i32_0 : i32, i32
  }
  func.func @transform_1(%arg0: i32) -> (i32, i32) {
    %c0_i32 = arith.constant 0 : i32
    %c0_i32_0 = arith.constant 0 : i32
    %c0_i32_1 = arith.constant 0 : i32
    return %c0_i32, %c0_i32_0 : i32, i32
  }
  func.func @transform_2(%arg0: i32) -> (i32, i32) {
    %c0_i32 = arith.constant 0 : i32
    %c0_i32_0 = arith.constant 0 : i32
    return %arg0, %c0_i32 : i32, i32
  }
  func.func @transform_3(%arg0: i32) -> (i32, i32) {
    %c0_i32 = arith.constant 0 : i32
    %c0_i32_0 = arith.constant 0 : i32
    return %arg0, %c0_i32 : i32, i32
  }
  func.func @transform_4(%arg0: i32) -> (i32, i32, i32) {
    %c0_i32 = arith.constant 0 : i32
    %c0_i32_0 = arith.constant 0 : i32
    %c0_i32_1 = arith.constant 0 : i32
    return %arg0, %c0_i32, %c0_i32_0 : i32, i32, i32
  }
}

</mosaic_0001>

<bundles_post_ra>
// kernel: tpu_custom_call.1
= control target key start
LH: loop header
LB: loop body
LE: loop exit
PB: predicated region body
PF: predicated region fallthrough
CT: control target
= control target key end

     0   :  { %v474_v3 = vmov 0.0|0.0   ;;  %vm475_vm0 = vmmov 0   ;;  %v476_v6 = vmov 0.0   ;;  %s575_s0 = inlined_call_operand.vmem [shape: f32[64,4], index: 0, kind: input, shape index: {}]   ;;  %s576_s1 = inlined_call_operand.vmem [shape: f32[64,64], index: 1, kind: input, shape index: {}]   ;;  %s577_s2 = inlined_call_operand.vmem [shape: f32[1,64], index: 2, kind: input, shape index: {}]   ;;  %s578_s3 = inlined_call_operand.vmem [shape: f32[1,64], index: 3, kind: input, shape index: {}]   ;;  %s579_s4 = inlined_call_operand.hbm [shape: f32[1,1,128], index: 4, kind: output, shape index: {}]  }
   0x1   :  { %v20_v0 = vld [vmem:[%s575_s0] sm:$0xff]  ;;  %v21_v1 = vld [vmem:[%s575_s0 + $0x8] sm:$0xff]  ;;  %v22_v2 = vld [vmem:[%s575_s0 + $0x10] sm:$0xff]  ;;  %404 = vmatprep.subr.bf16.mxu0 %v474_v3  ;;  %416 = vmatprep.subr.bf16.mxu1 %v474_v3 }
   0x2   :  { %v405_v4 = vpack.c.bf16 %v21_v1, %v20_v0  ;;  %v23_v5 = vld [vmem:[%s575_s0 + $0x18] sm:$0xff]  ;;  %363 = vmatprep.mubr.msk.f32.mxu0 %vm475_vm0, %v476_v6  ;;  %382 = vmatprep.mubr.msk.f32.mxu1 %vm475_vm0, %v476_v6  ;;  %v24_v8 = vld [vmem:[%s575_s0 + $0x20] sm:$0xff]  ;;  %v25_v9 = vld [vmem:[%s575_s0 + $0x28] sm:$0xff] }
   0x3   :  { %v408_v7 = vpack.c.bf16 %v23_v5, %v22_v2 }
   0x4   :  { %406 = vmatpush3.bf16.msra.mxu0 %v405_v4  ;;  %418 = vmatpush3.bf16.msra.mxu1 %v405_v4 }
   0x5   :  { %407 = vmatprep.subr.bf16.mxu0 %v474_v3  ;;  %419 = vmatprep.subr.bf16.mxu1 %v474_v3 }
   0x6   :  { %9 = vsyncpa [#allocation3], 0  ;;  %v411_v10 = vpack.c.bf16 %v25_v9, %v24_v8  ;;  %v26_v11 = vld [vmem:[%s575_s0 + $0x30] sm:$0xff]  ;;  %v27_v12 = vld [vmem:[%s575_s0 + $0x38] sm:$0xff]  ;;  %vm36_vm1 = vcmask 523264   ;;  %vm196_vm3 = vcmask 24576   ;;  %v293_v63 = vlaneseq }
   0x7   :  { %v414_v13 = vpack.c.bf16 %v27_v12, %v26_v11  ;;  %v18_v14 = vld [vmem:[%s577_s2] sm:$0x1]  ;;  %v29_v16 = vld [vmem:[%s576_s1 + $0x8] sm:$0xff]  ;;  %v30_v19 = vld [vmem:[%s576_s1 + $0x10] sm:$0xff]  ;;  %vm282_vm5 = vcmask 516096   ;;  %s477_s23 = smov [#allocation2]  }
   0x8   :  { %409 = vmatpush3.bf16.msra.mxu0 %v408_v7  ;;  %421 = vmatpush3.bf16.msra.mxu1 %v408_v7  ;;  %v28_v15 = vld [vmem:[%s576_s1] sm:$0xff]  ;;  %v110_v17 = vmul.f32 %v18_v14, %v18_v14  ;;  %v31_v20 = vld [vmem:[%s576_s1 + $0x18] sm:$0xff]  ;;  %v33_v23 = vld [vmem:[%s576_s1 + $0x28] sm:$0xff]  ;;  %v294_v0 = vand.u32 127, %v293_v63  ;;  %s309_s24 = sshll.u32 %s477_s23, 4  ;;  %s310_s24 = int_to_ptr.vmem [resolvable:$true] %s309_s24 }
   0x9   :  { %410 = vmatprep.subr.bf16.mxu0 %v474_v3  ;;  %422 = vmatprep.subr.bf16.mxu1 %v474_v3  ;;  %v429_v18 = vpack.c.bf16 %v29_v16, %v28_v15  ;;  %v432_v21 = vpack.c.bf16 %v31_v20, %v30_v19  ;;  %v32_v22 = vld [vmem:[%s576_s1 + $0x20] sm:$0xff]  ;;  %v34_v25 = vld [vmem:[%s576_s1 + $0x30] sm:$0xff]  ;;  %v35_v26 = vld [vmem:[%s576_s1 + $0x38] sm:$0xff]  ;;  %s450_s25 = scalar_lea.vmem %s310_s24, 16  ;;  %s454_s26 = scalar_lea.vmem %s310_s24, 32 }
   0xa   :  { %v435_v24 = vpack.c.bf16 %v33_v23, %v32_v22  ;;  %v438_v27 = vpack.c.bf16 %v35_v26, %v34_v25  ;;  %v19_v28 = vld [vmem:[%s578_s3] sm:$0x1]  ;;  %vm295_vm6 = vcmp.eq.s32.totalorder %v294_v0, 0  ;;  %vm298_vm7 = vcmp.eq.s32.totalorder %v294_v0, 1  ;;  %p451_p0 = scmp.ne.s32.totalorder %s310_s24, %s450_s25  ;;  %p455_p1 = scmp.lt.s32.totalorder %s310_s24, %s310_s24 }
   0xb   :  { %p456_p2 = scmp.lt.s32.totalorder %s454_s26, %s450_s25 }
   0xc   :  { %412 = vmatpush3.bf16.msra.mxu0 %v411_v10  ;;  %424 = vmatpush3.bf16.msra.mxu1 %v411_v10 }
   0xd   :  { %413 = vmatprep.subr.bf16.mxu0 %v474_v3  ;;  %425 = vmatprep.subr.bf16.mxu1 %v474_v3  ;;  %p457_p3 = por %p456_p2, %p455_p1 }
   0xf   :  { %p458_p4 = pnand %p457_p3, %p451_p0 }
  0x10   :  { %415 = vmatpush3.bf16.msra.mxu0 %v414_v13  ;;  %427 = vmatpush3.bf16.msra.mxu1 %v414_v13 }
  0x11   :  { %428 = vmatprep.subr.bf16.mxu0 %v474_v3 }
  0x13   :  { %364 = vmatmul.mubr.msk.f32.vlgmr.msra.gmra.mrb[0].mxu0 %vm36_vm1, %v18_v14  ;;  %383 = vmatmul.mubr.msk.f32.vlgmr.msra.gmra.mrb[0].mxu1 %vm36_vm1, %v110_v17 }
  0x14   :  { %430 = vmatpush3.bf16.msra.mxu0 %v429_v18  ;;  %401 = vmatprep.mubr.msk.f32.mxu0 %vm475_vm0, %v476_v6 }
  0x15   :  { %431 = vmatprep.subr.bf16.mxu0 %v474_v3 }
  0x18   :  { %433 = vmatpush3.bf16.msra.mxu0 %v432_v21 }
  0x19   :  { %434 = vmatprep.subr.bf16.mxu0 %v474_v3 }
  0x1c   :  { %436 = vmatpush3.bf16.msra.mxu0 %v435_v24 }
  0x1d   :  { %437 = vmatprep.subr.bf16.mxu0 %v474_v3 }
  0x20   :  { %439 = vmatpush3.bf16.msra.mxu0 %v438_v27 }
  0x23   :  { %402 = vmatmul.mubr.msk.f32.vlgmr.msra.gmra.mrb[2].mxu0 %vm36_vm1, %v19_v28 }
  0xe6   :  { %v106_v29 = vpop.f32.mrb[0].mxu0  ;;  %v180_v30 = vpop.f32.mrb[0].mxu1 }
  0xe7   :  { %v184_v31 = vmul.f32 %v106_v29, %v106_v29  ;;  %v365_v32 = vpop.f32.mrb[1].mxu0  ;;  %v384_v33 = vpop.f32.mrb[1].mxu1 }
  0xe9   :  { %v185_v34 = vmul.f32 0.0625, %v184_v31 }
  0xeb   :  { %v186_v35 = vsub.f32 %v180_v30, %v185_v34 }
  0xed   :  { %v187_v36 = vmul.f32 0.06666667, %v186_v35 }
  0xef   :  { %v188_v37 = vmax.f32 %v187_v36, 0.0 }
  0xf1   :  { %448 = vrsqrt.f32 %v188_v37  ;;  %vm191_vm2 = vcmp.eq.f32.partialorder %v188_v37, inf  ;;  %v194_v43 = vand.u32 2147483648, %v188_v37  ;;  %vm193_vm4 = vcmp.eq.f32.partialorder %v188_v37, 0.0 }
  0xf6   :  { %v276_v38 = vpop.f32.mrb[2].mxu0 }
  0xf7   :  { %v403_v39 = vpop.f32.mrb[3].mxu0  ;;  %v280_v40 = vsub.f32 %v18_v14, %v276_v38 }
  0xf9   :  { %v281_v44 = vand.u32 2147483647, %v280_v40 }
  0xfb   :  { %v449_v41 = vpop.eup %448  ;;  %v283_v48 = vsel %vm282_vm5, %v281_v44, 0.0 }
  0xfc   :  { %v190_v42 = vmul.f32 %v449_v41, %v188_v37 }
  0xfe   :  { %v192_v45 = vsel %vm191_vm2, %v188_v37, %v190_v42 }
  0xff   :  { %v195_v46 = vsel %vm193_vm4, %v194_v43, %v192_v45 }
 0x100   :  { %v197_v47 = vsel %vm196_vm3, %v195_v46, 0.0 }
 0x101   :  { %198 = vadd.xlane.f32.xlu0 %v197_v47 }
 0x105   :  { %284 = vadd.xlane.f32.xlu0 %v283_v48 }
 0x18e   :  { %v199_v49 = vpop.xlane.xlu0 %198 }
 0x18f   :  { %v200_v50 = vrot.slane %v199_v49, 4 }
 0x191   :  { %v201_v51 = vadd.f32 %v200_v50, %v199_v49 }
 0x192   :  { %v285_v52 = vpop.xlane.xlu0 %284 }
 0x193   :  { %v202_v53 = vrot.slane %v201_v51, 2  ;;  %v286_v54 = vrot.slane %v285_v52, 4 }
 0x195   :  { %v287_v55 = vadd.f32 %v286_v54, %v285_v52  ;;  %v203_v56 = vadd.f32 %v202_v53, %v201_v51 }
 0x197   :  { %v288_v57 = vrot.slane %v287_v55, 2  ;;  %v204_v58 = vrot.slane %v203_v56, 1 }
 0x199   :  { %v289_v59 = vadd.f32 %v288_v57, %v287_v55  ;;  %v205_v60 = vadd.f32 %v204_v58, %v203_v56 }
 0x19b   :  { %440 = vpush %v205_v60  ;;  %v290_v61 = vrot.slane %v289_v59, 1 }
 0x19d   :  { %v291_v62 = vadd.f32 %v290_v61, %v289_v59 }
 0x19f   :  { %442 = vpush %v291_v62 }
 0x1cc   :  { %s441_s1 = spop %440 }
 0x1cd   :  { %v296_v1 = vstv %s441_s1 }
 0x1ce   :  { %v297_v3 = vsel %vm295_vm6, %v296_v1, 0.0 }
 0x1d0   :  { %s443_s3 = spop %442 }
 0x1d1   :  { %v299_v2 = vstv %s443_s3 }
 0x1d2   :  { %v300_v4 = vsel %vm298_vm7, %v299_v2, 0.0 }
 0x1d3   :  { %v301_v5 = vadd.f32 %v300_v4, %v297_v3 }
 0x1d5   :  { %302 = vst [vmem:[#allocation2] sm:$0x1] %v301_v5 }
 0x1d6   :  { %461 = shalt.err (!%p458_p4)
}
 0x1d7   :  { %s462_s29 = scalar_lea.hbm %s579_s4, 16 }
 0x1d8   :  { %p463_p5 = scmp.ne.s32.totalorder %s579_s4, %s462_s29  ;;  %p466_p6 = scmp.lt.u32.totalorder %s462_s29, %s579_s4 }
 0x1da   :  { %p468_p7 = pnand %p466_p6, %p463_p5 }
 0x1dc   :  { %471 = shalt.err (!%p468_p7)
}
 0x1dd   :  { %312 = dma.vmem_to_hbm [thread:$0]  %s310_s24, 16, %s579_s4, [#allocation3]  }
 0x1de   :  { %472 = dma.done.wait [#allocation3], 16  }
 0x1df   :  { %473 = vsyncadd [#allocation3], 4294967280 }
 0x1e0   :  { %316 = vsyncpa [#allocation3], 1 }

</bundles_post_ra>
